<compile_context>
chip_gen: v7x
topology: tpu7x:2x2x1
jax: 0.10.0
libtpu: 0.0.40
codegen_flags: <defaults>
</compile_context>

<pallas_src>
import functools

import jax
import jax.numpy as jnp
from jax.experimental import pallas as pl
from jax.experimental.pallas import tpu as pltpu


def _round_up(v, m):
    return (v + m - 1) // m * m


def _sublane_pack(dtype):
    # rows per sublane group: f32 -> 8, bf16 -> 16, int8/fp8 -> 32
    return max(8, 32 // jnp.dtype(dtype).itemsize)


def _vmem_budget_bytes():
    cap = 64 * 1024 * 1024  # conservative default (v7x per-TC VMEM)
    try:
        info = pltpu.get_tpu_info()
        cap = int(getattr(info, "vmem_capacity_bytes", cap))
    except Exception:
        pass
    # Leave ample headroom for compiler-internal scratch / spills.
    return max(cap // 2, 16 * 1024 * 1024)


def _pick_tn(N, K, w_bytes, budget):
    """Largest lane tile (multiple of 128, dividing N) whose double-buffered
    weight tile stays well inside the VMEM budget."""
    cands = ([N] if N <= 512 else []) + [c for c in (512, 256, 128)
                                         if c < N and N % c == 0]
    if not cands:
        cands = [128]
    for c in cands:
        if 2 * K * c * w_bytes <= budget // 2:
            return c
    return cands[-1]


def _pick_tm(K, tN, x_bytes, w_bytes, o_bytes, row_pack, budget, extent):
    """Largest row tile (multiple of the sublane pack, capped by the row
    extent) that keeps double-buffered x/out tiles + the weight tile in VMEM."""
    fixed = 2 * K * tN * w_bytes + 16 * tN * 4 + (2 << 20)
    upper = _round_up(max(int(extent), row_pack), row_pack)
    for cand in (1024, 512, 256, 128, 64, 32, 16, 8):
        if cand % row_pack or cand > upper:
            continue
        if fixed + 2 * cand * K * x_bytes + 2 * cand * tN * o_bytes <= budget:
            return cand
    return row_pack


def _vmem_estimate(tM, tN, K, x_bytes, w_bytes, o_bytes):
    return (2 * tM * K * x_bytes + 2 * tM * tN * o_bytes
            + 2 * K * tN * w_bytes + 16 * tN * 4 + (2 << 20))


def shared_dropout_mask(key, batch, n_cols, keep_prob, dtype=jnp.float32):
    """SharedDropout mask: one (batch, 1, n_cols) float mask (0 or 1/keep)."""
    keep = jax.random.bernoulli(key, keep_prob, (batch, 1, n_cols))
    return keep.astype(dtype) / jnp.asarray(keep_prob, dtype)


def _mlp_kernel(x_ref, wt_ref, b_ref, *rest, negative_slope, apply_activation,
                apply_dropout):
    # x_ref : (tM, K)    input rows (K = n_in, full extent)
    # wt_ref: (K, tN)    W^T tile, in the input dtype (bf16 MXU path for bf16)
    # b_ref : (1, tN)    bias (f32)
    # mask  : (1, tN)    shared-dropout scale (f32), only when dropout active
    # o_ref : (tM, tN)
    if apply_dropout:
        mask_ref, o_ref = rest
    else:
        (o_ref,) = rest

    y = jnp.dot(x_ref[...], wt_ref[...], preferred_element_type=jnp.float32)
    y = y + b_ref[...]
    if apply_activation:
        y = jnp.where(y >= 0.0, y, jnp.float32(negative_slope) * y)
    if apply_dropout:
        y = y * mask_ref[...]          # broadcast over rows: shared across seq
    o_ref[...] = y.astype(o_ref.dtype)


def mlp_forward(x, weight, bias, *, p=0.0, activation=True,
                negative_slope=0.1, training=True, rng_key=None):
    """Pallas equivalent of MLP.forward for x of shape [B, S, n_in].

    weight: [n_out, n_in] (PyTorch nn.Linear layout), bias: [n_out].
    SharedDropout (batch_first=True): one mask per batch row, shared over seq.
    """
    B, S, n_in = x.shape
    n_out = weight.shape[0]
    out_dtype = x.dtype
    x_bytes = jnp.dtype(x.dtype).itemsize
    o_bytes = jnp.dtype(out_dtype).itemsize

    # Output features padded to a lane multiple (128) -> unmasked lane-dense
    # stores; skipped entirely when already aligned.
    N = _round_up(n_out, 128)

    # Weight stays in the INPUT dtype (don't force the MXU onto the f32 path).
    wt = weight.astype(x.dtype).T                       # (n_in, n_out)
    if N != n_out:
        wt = jnp.zeros((n_in, N), dtype=x.dtype).at[:, :n_out].set(wt)
    w_bytes = jnp.dtype(wt.dtype).itemsize
    b2 = bias.astype(jnp.float32).reshape(1, n_out)
    if N != n_out:
        b2 = jnp.zeros((1, N), dtype=jnp.float32).at[:, :n_out].set(b2)

    apply_dropout = bool(training) and float(p) > 0.0
    row_pack = max(_sublane_pack(x.dtype), _sublane_pack(out_dtype))
    budget = _vmem_budget_bytes()
    tN = _pick_tn(N, n_in, w_bytes, budget)

    kernel = functools.partial(
        _mlp_kernel,
        negative_slope=float(negative_slope),
        apply_activation=bool(activation),
        apply_dropout=apply_dropout,
    )

    def _params(grid_len, vmem):
        return pltpu.CompilerParams(
            dimension_semantics=("parallel",) * grid_len,
            vmem_limit_bytes=int(vmem),
        )

    if not apply_dropout:
        # ---- fast path: flatten (B, S) -> M for a tall MXU M dimension ----
        M = B * S
        x2 = x.reshape(M, n_in)                      # free (contiguous)
        tM = _pick_tm(n_in, tN, x_bytes, w_bytes, o_bytes, row_pack, budget, M)
        est = _vmem_estimate(tM, tN, n_in, x_bytes, w_bytes, o_bytes)
        vmem = min(max(est, 16 << 20), budget)
        grid = (N // tN, pl.cdiv(M, tM))             # N outer -> weight stays put
        out2 = pl.pallas_call(
            kernel,
            out_shape=jax.ShapeDtypeStruct((M, N), out_dtype),
            grid=grid,
            in_specs=[
                pl.BlockSpec((tM, n_in), lambda n, m: (m, 0)),   # x rows
                pl.BlockSpec((n_in, tN), lambda n, m: (0, n)),   # W^T tile
                pl.BlockSpec((1, tN), lambda n, m: (0, n)),      # bias
            ],
            out_specs=pl.BlockSpec((tM, tN), lambda n, m: (m, n)),
            compiler_params=_params(len(grid), vmem),
        )(x2, wt, b2)
        out = out2.reshape(B, S, N)
    else:
        # ---- SharedDropout path: tiles stay within one batch row so the
        # per-batch (1, tN) mask block applies to the whole tile ----
        if rng_key is None:
            rng_key = jax.random.PRNGKey(0)
        keep_prob = 1.0 - float(p)
        mask = shared_dropout_mask(rng_key, B, n_out, keep_prob)   # (B,1,n_out)
        if N != n_out:
            mask = jnp.zeros((B, 1, N), jnp.float32).at[:, :, :n_out].set(mask)
        tS = _pick_tm(n_in, tN, x_bytes, w_bytes, o_bytes, row_pack, budget, S)
        est = _vmem_estimate(tS, tN, n_in, x_bytes, w_bytes, o_bytes)
        vmem = min(max(est, 16 << 20), budget)
        grid = (N // tN, B, pl.cdiv(S, tS))
        out = pl.pallas_call(
            kernel,
            out_shape=jax.ShapeDtypeStruct((B, S, N), out_dtype),
            grid=grid,
            in_specs=[
                pl.BlockSpec((None, tS, n_in), lambda n, b, s: (b, s, 0)),  # x
                pl.BlockSpec((n_in, tN), lambda n, b, s: (0, n)),           # W^T
                pl.BlockSpec((1, tN), lambda n, b, s: (0, n)),              # bias
                pl.BlockSpec((None, 1, tN), lambda n, b, s: (b, 0, n)),     # mask
            ],
            out_specs=pl.BlockSpec((None, tS, tN), lambda n, b, s: (b, s, n)),
            compiler_params=_params(len(grid), vmem),
        )(x, wt, b2, mask)

    if N != n_out:
        out = out[..., :n_out]
    return out


if __name__ == "__main__":
    key = jax.random.PRNGKey(0)
    kx, kw, kd = jax.random.split(key, 3)

    B, S, n_in, n_out = 2, 8, 32, 32
    x = jax.random.normal(kx, (B, S, n_in), dtype=jnp.float32)
    W = jax.random.normal(kw, (n_out, n_in), dtype=jnp.float32) / jnp.sqrt(n_in)
    b = jnp.zeros((n_out,), dtype=jnp.float32)   # reset_parameters(): zero bias

    def leaky(v):
        return jnp.where(v >= 0.0, v, 0.1 * v)

    ref = leaky(jnp.einsum("bsi,oi->bso", x, W) + b)

    # 1) no dropout (flattened-M fast path): exact match vs pure-JAX reference
    out0 = jax.block_until_ready(
        mlp_forward(x, W, b, p=0.0, activation=True, training=True))
    assert out0.shape == (B, S, n_out) and out0.dtype == x.dtype
    assert bool(jnp.allclose(out0, ref, atol=1e-5, rtol=1e-5))

    # 2) training with SharedDropout p=0.5: matches ref * shared per-row mask
    p = 0.5
    out1 = jax.block_until_ready(
        mlp_forward(x, W, b, p=p, activation=True, training=True, rng_key=kd))
    mask = shared_dropout_mask(kd, B, n_out, 1.0 - p)           # (B, 1, n_out)
    expected = ref * mask                                        # shared over seq
    assert bool(jnp.allclose(out1, expected, atol=1e-5, rtol=1e-5))

    # 3) eval mode: dropout is identity
    out_eval = jax.block_until_ready(
        mlp_forward(x, W, b, p=p, activation=True, training=False))
    assert bool(jnp.allclose(out_eval, ref, atol=1e-5, rtol=1e-5))

    # 4) bf16 inputs exercise the native-bf16 MXU path
    xb = x.astype(jnp.bfloat16)
    outb = jax.block_until_ready(
        mlp_forward(xb, W, b, p=0.0, activation=True, training=False))
    refb = leaky(jnp.einsum("bsi,oi->bso", xb.astype(jnp.float32),
                            W.astype(jnp.bfloat16).astype(jnp.float32)) + b)
    assert outb.dtype == jnp.bfloat16
    assert bool(jnp.allclose(outb.astype(jnp.float32), refb, atol=0.08, rtol=0.08))

    print("KERNEL_OK")
</pallas_src>

<mosaic_0001>
module attributes {stable_mosaic.version = 11 : i64} {
  func.func @_mlp_kernel(%arg0: i32, %arg1: i32, %arg2: memref<16x32xf32, #tpu.memory_space<vmem>>, %arg3: memref<32x128xf32, #tpu.memory_space<vmem>>, %arg4: memref<1x128xf32, #tpu.memory_space<vmem>>, %arg5: memref<16x128xf32, #tpu.memory_space<vmem>>) attributes {dimension_semantics = [#tpu.dimension_semantics<parallel>, #tpu.dimension_semantics<parallel>], iteration_bounds = array<i64: 1, 1>, scalar_prefetch = 0 : i64, scratch_operands = 0 : i64, tpu.core_type = #tpu.core_type<tc>, window_params = [{transform_indices = @transform_0, window_bounds = array<i64: 16, 32>}, {transform_indices = @transform_1, window_bounds = array<i64: 32, 128>}, {transform_indices = @transform_2, window_bounds = array<i64: 1, 128>}, {transform_indices = @transform_3, window_bounds = array<i64: 16, 128>}]} {
    %c0 = arith.constant 0 : index
    %c0_0 = arith.constant 0 : index
    %0 = vector.load %arg2[%c0, %c0_0] : memref<16x32xf32, #tpu.memory_space<vmem>>, vector<16x32xf32>
    %c0_1 = arith.constant 0 : index
    %c0_2 = arith.constant 0 : index
    %1 = vector.load %arg3[%c0_1, %c0_2] : memref<32x128xf32, #tpu.memory_space<vmem>>, vector<32x128xf32>
    %cst = arith.constant dense<0.000000e+00> : vector<16x128xf32>
    %2 = tpu.matmul %0, %1, %cst {dimension_numbers = #tpu.dot_dimension_numbers<[1], [0], [0], [1], [0, 0, 1, 1], [], []>} : vector<16x32xf32>, vector<32x128xf32>, vector<16x128xf32> -> vector<16x128xf32>
    %c0_3 = arith.constant 0 : index
    %c0_4 = arith.constant 0 : index
    %3 = vector.load %arg4[%c0_3, %c0_4] : memref<1x128xf32, #tpu.memory_space<vmem>>, vector<1x128xf32>
    %4 = vector.broadcast %3 : vector<1x128xf32> to vector<16x128xf32>
    %5 = arith.addf %2, %4 : vector<16x128xf32>
    %cst_5 = arith.constant 0.000000e+00 : f32
    %6 = vector.broadcast %cst_5 : f32 to vector<16x128xf32>
    %7 = arith.cmpf oge, %5, %6 : vector<16x128xf32>
    %cst_6 = arith.constant 1.000000e-01 : f32
    %8 = vector.broadcast %cst_6 : f32 to vector<16x128xf32>
    %9 = arith.mulf %8, %5 : vector<16x128xf32>
    %10 = arith.select %7, %5, %9 : vector<16x128xi1>, vector<16x128xf32>
    %c0_7 = arith.constant 0 : index
    %c0_8 = arith.constant 0 : index
    %11 = vector.load %arg5[%c0_7, %c0_8] : memref<16x128xf32, #tpu.memory_space<vmem>>, vector<16x128xf32>
    tpu.vector_store %arg5[%c0_7, %c0_8], %10 {strides = array<i32>} : memref<16x128xf32, #tpu.memory_space<vmem>>, vector<16x128xf32>,
    return
  }
  func.func @transform_0(%arg0: i32, %arg1: i32) -> (i32, i32) {
    %c0_i32 = arith.constant 0 : i32
    %c0_i32_0 = arith.constant 0 : i32
    return %arg1, %c0_i32 : i32, i32
  }
  func.func @transform_1(%arg0: i32, %arg1: i32) -> (i32, i32) {
    %c0_i32 = arith.constant 0 : i32
    %c0_i32_0 = arith.constant 0 : i32
    return %c0_i32, %arg0 : i32, i32
  }
  func.func @transform_2(%arg0: i32, %arg1: i32) -> (i32, i32) {
    %c0_i32 = arith.constant 0 : i32
    %c0_i32_0 = arith.constant 0 : i32
    return %c0_i32, %arg0 : i32, i32
  }
  func.func @transform_3(%arg0: i32, %arg1: i32) -> (i32, i32) {
    %c0_i32 = arith.constant 0 : i32
    return %arg1, %arg0 : i32, i32
  }
}

</mosaic_0001>

<bundles_post_ra>
// kernel: tpu_custom_call.1
= control target key start
LH: loop header
LB: loop body
LE: loop exit
PB: predicated region body
PF: predicated region fallthrough
CT: control target
= control target key end

     0   :  { %8 = vsyncpa [#allocation3], 0  ;;  %s342_s0 = inlined_call_operand.hbm [shape: f32[16,32], index: 0, kind: input, shape index: {}]   ;;  %s343_s1 = inlined_call_operand.hbm [shape: f32[32,128], index: 1, kind: input, shape index: {}]   ;;  %s344_s2 = inlined_call_operand.vmem [shape: f32[1,128], index: 2, kind: input, shape index: {}]   ;;  %s345_s3 = inlined_call_operand.hbm [shape: f32[16,128], index: 3, kind: output, shape index: {}]  }
   0x1   :  { %9 = vsyncpa [#allocation6], 0 }
   0x2   :  { %10 = vsyncpa [#allocation4], 0  ;;  %s269_s12 = smov [#allocation2]   ;;  %s197_s16 = scalar_lea.hbm %s342_s0, 256 }
   0x3   :  { %s16_s13 = sshll.u32 %s269_s12, 4  ;;  %p198_p0 = scmp.ne.s32.totalorder %s342_s0, %s197_s16  ;;  %s17_s13 = int_to_ptr.vmem [resolvable:$true] %s16_s13 }
   0x4   :  { %p201_p1 = scmp.lt.u32.totalorder %s197_s16, %s342_s0 }
   0x6   :  { %p203_p2 = pnand %p201_p1, %p198_p0 }
   0x8   :  { %206 = shalt.err (!%p203_p2)
}
   0x9   :  { %s207_s21 = scalar_lea.vmem %s17_s13, 256  ;;  %p212_p4 = scmp.lt.s32.totalorder %s17_s13, %s17_s13 }
   0xa   :  { %p208_p3 = scmp.ne.s32.totalorder %s17_s13, %s207_s21  ;;  %p213_p5 = scmp.lt.s32.totalorder %s207_s21, %s207_s21 }
   0xc   :  { %p214_p6 = por %p213_p5, %p212_p4 }
   0xe   :  { %p215_p7 = pnand %p214_p6, %p208_p3 }
  0x10   :  { %218 = shalt.err (!%p215_p7)
}
  0x11   :  { %s270_s22 = smov 128   ;;  %s271_s23 = smov 8  }
  0x12   :  { %22 = dma.hbm_to_vmem [thread:$0]  %s342_s0, 256, %s17_s13, [#allocation3], %s270_s22, %s270_s22, %s271_s23  }
  0x13   :  { %s272_s26 = smov [#allocation5]   ;;  %s219_s30 = scalar_lea.hbm %s343_s1, 512 }
  0x14   :  { %s28_s27 = sshll.u32 %s272_s26, 4  ;;  %p220_p8 = scmp.ne.s32.totalorder %s343_s1, %s219_s30  ;;  %s29_s27 = int_to_ptr.vmem [resolvable:$true] %s28_s27 }
  0x15   :  { %p223_p9 = scmp.lt.u32.totalorder %s219_s30, %s343_s1 }
  0x17   :  { %p225_p10 = pnand %p223_p9, %p220_p8 }
  0x19   :  { %228 = shalt.err (!%p225_p10)
}
  0x1a   :  { %s229_s8 = scalar_lea.vmem %s29_s27, 512  ;;  %p234_p12 = scmp.lt.s32.totalorder %s29_s27, %s29_s27 }
  0x1b   :  { %p230_p11 = scmp.ne.s32.totalorder %s29_s27, %s229_s8  ;;  %p235_p13 = scmp.lt.s32.totalorder %s229_s8, %s229_s8 }
  0x1d   :  { %p236_p0 = por %p235_p13, %p234_p12 }
  0x1f   :  { %p237_p1 = pnand %p236_p0, %p230_p11 }
  0x21   :  { %240 = shalt.err (!%p237_p1)
}
  0x22   :  { %34 = dma.hbm_to_vmem [thread:$0]  %s343_s1, 512, %s29_s27, [#allocation6], %s270_s22, %s270_s22, %s271_s23  }
  0x23   :  { %263 = dma.done.wait [#allocation3], 256  }
  0x24   :  { %264 = vsyncadd [#allocation3], 4294967040 }
  0x25   :  { %265 = dma.done.wait [#allocation6], 512  }
  0x26   :  { %266 = vsyncadd [#allocation6], 4294966784  ;;  %vm56_vm0 = vcmask 261120   ;;  %v45_v0 = vld [vmem:[#allocation5] sm:$0xff]  ;;  %v46_v1 = vld [vmem:[#allocation5 + $0x8] sm:$0xff]  ;;  %s273_s11 = smov [#allocation7]  }
  0x27   :  { %v47_v2 = vld [vmem:[#allocation5 + $0x10] sm:$0xff]  ;;  %v184_v3 = vpack.c.bf16 %v46_v1, %v45_v0  ;;  %v48_v4 = vld [vmem:[#allocation5 + $0x18] sm:$0xff]  ;;  %s151_s12 = sshll.u32 %s273_s11, 4  ;;  %s152_s12 = int_to_ptr.vmem [resolvable:$true] %s151_s12 }
  0x28   :  { %v43_v5 = vld [vmem:[#allocation2] sm:$0xff]  ;;  %v188_v6 = vpack.c.bf16 %v48_v4, %v47_v2  ;;  %v44_v7 = vld [vmem:[#allocation2 + $0x8] sm:$0xff]  ;;  %s241_s13 = scalar_lea.vmem %s152_s12, 256  ;;  %p246_p3 = scmp.lt.s32.totalorder %s152_s12, %s152_s12 }
  0x29   :  { %181 = vmatprep.mubr.msk.f32.mxu0 %vm56_vm0, %v43_v5  ;;  %185 = vmatprep.subr.bf16.mxu0 %v184_v3  ;;  %v164_v8 = vld [vmem:[%s344_s2] ss:$0 sm:$0xff]  ;;  %p242_p2 = scmp.ne.s32.totalorder %s152_s12, %s241_s13  ;;  %p247_p4 = scmp.lt.s32.totalorder %s241_s13, %s241_s13 }
  0x2a   :  { %187 = vmatpush3.bf16.msra.mxu0 %v184_v3 }
  0x2b   :  { %189 = vmatprep.subr.bf16.mxu0 %v188_v6  ;;  %p248_p5 = por %p247_p4, %p246_p3 }
  0x2d   :  { %p249_p6 = pnand %p248_p5, %p242_p2 }
  0x2e   :  { %191 = vmatpush3.bf16.msra.mxu0 %v188_v6 }
  0x31   :  { %182 = vmatmul.mubr.msk.f32.vlgmr.msra.gmra.mrb[0].mxu0 %vm56_vm0, %v44_v7 }
 0x104   :  { %v183_v9 = vpop.f32.mrb[0].mxu0 }
 0x105   :  { %v135_v10 = vadd.f32 %v183_v9, %v164_v8  ;;  %v129_v11 = vpop.f32.mrb[1].mxu0 }
 0x106   :  { %v130_v12 = vadd.f32 %v164_v8, %v129_v11 }
 0x107   :  { %vm139_vm1 = vcmp.ge.f32.partialorder %v135_v10, 0.0  ;;  %v141_v13 = vmul.f32 0.1, %v135_v10 }
 0x108   :  { %vm138_vm2 = vcmp.ge.f32.partialorder %v130_v12, 0.0  ;;  %v140_v14 = vmul.f32 0.1, %v130_v12 }
 0x109   :  { %v143_v15 = vsel %vm139_vm1, %v135_v10, %v141_v13 }
 0x10a   :  { %v142_v16 = vsel %vm138_vm2, %v130_v12, %v140_v14  ;;  %145 = vst [vmem:[#allocation7 + $0x8] sm:$0xff] %v143_v15 }
 0x10b   :  { %144 = vst [vmem:[#allocation7] sm:$0xff] %v142_v16 }
 0x10c   :  { %252 = shalt.err (!%p249_p6)
}
 0x10d   :  { %s253_s15 = scalar_lea.hbm %s345_s3, 256 }
 0x10e   :  { %p254_p7 = scmp.ne.s32.totalorder %s345_s3, %s253_s15  ;;  %p257_p8 = scmp.lt.u32.totalorder %s253_s15, %s345_s3 }
 0x110   :  { %p259_p9 = pnand %p257_p8, %p254_p7 }
 0x112   :  { %262 = shalt.err (!%p259_p9)
}
 0x113   :  { %157 = dma.vmem_to_hbm [thread:$0]  %s152_s12, 256, %s345_s3, [#allocation4], %s270_s22, %s270_s22, %s271_s23  }
 0x114   :  { %267 = dma.done.wait [#allocation4], 256  }
 0x115   :  { %268 = vsyncadd [#allocation4], 4294967040 }
 0x116   :  { %161 = vsyncpa [#allocation3], 1 }
 0x117   :  { %162 = vsyncpa [#allocation6], 1 }
 0x118   :  { %163 = vsyncpa [#allocation4], 1 }

</bundles_post_ra>
